<compile_context>
chip_gen: v5e
topology: v5e:2x2
jax: 0.10.0
libtpu: 0.0.40
codegen_flags: <defaults>
</compile_context>

<pallas_src>
import functools

import jax
import jax.numpy as jnp
from jax.experimental import pallas as pl
from jax.experimental.pallas import tpu as pltpu


def _sum_over_antennas(x, A, S):
    """Reduce a lane-flat (TB, A*S) f32 array (lane index = a*S + s) over a.

    Power-of-two A: butterfly all-reduce with cyclic XLU rolls (log2(A) steps,
    direction-agnostic); afterwards every S-wide chunk holds the full sum, so
    the first chunk is returned.  Other A: static lane-slice accumulation.
    """
    if A <= 1:
        return x
    if A & (A - 1) == 0:
        shift = (A // 2) * S
        while shift >= S:
            x = x + pltpu.roll(x, shift=shift, axis=1)
            shift //= 2
        return x[:, 0:S]
    acc = x[:, 0:S]
    for a in range(1, A):
        acc = acc + x[:, a * S:(a + 1) * S]
    return acc


def _cos2_kernel(wt_ref, wp_ref, out_ref, *, A, S):
    # wt_ref / wp_ref: (TB, 2*A*S) in the input dtype, lane = c*A*S + a*S + s.
    # out_ref: (TB, S) f32 holding cos^2 per (batch row, subcarrier).
    AS = A * S
    t_re = wt_ref[:, 0:AS].astype(jnp.float32)
    t_im = wt_ref[:, AS:2 * AS].astype(jnp.float32)
    p_re = wp_ref[:, 0:AS].astype(jnp.float32)
    p_im = wp_ref[:, AS:2 * AS].astype(jnp.float32)

    num_re = _sum_over_antennas(t_re * p_re + t_im * p_im, A, S)
    num_im = _sum_over_antennas(t_im * p_re - t_re * p_im, A, S)
    den0 = _sum_over_antennas(t_re * t_re + t_im * t_im, A, S)
    den1 = _sum_over_antennas(p_re * p_re + p_im * p_im, A, S)

    # (sqrt(|num|)/(sqrt(den0)*sqrt(den1)))^2 == |num|^2 / (den0*den1): no sqrt.
    # NOTE: like the PyTorch reference, an all-zero (b, s) column gives 0/0 -> NaN.
    out_ref[...] = (num_re * num_re + num_im * num_im) / (den0 * den1)


def _vmem_capacity_bytes():
    try:
        info = pltpu.get_tpu_info()
        for attr in ("vmem_capacity_bytes", "vmem_size_bytes", "vmem_bytes"):
            v = getattr(info, attr, None)
            if v:
                return int(v)
    except Exception:
        pass
    return 64 << 20  # conservative: v7x per-TensorCore VMEM


def _pick_tb(B, A, S, itemsize, budget_bytes):
    """Batch-tile size from the VMEM budget (inputs + f32 intermediates)."""
    AS = A * S
    per_item = (4 * 2 * AS * itemsize      # 2 inputs x 2 pipeline buffers
                + 12 * AS * 4              # live f32 casts/products/roll temps
                + 2 * S * 4)               # double-buffered output row
    cap = max(1, int(budget_bytes) // per_item)
    tb = min(B, cap)
    # Keep >= 2 grid steps when the batch allows it, so v7x can shard the
    # "parallel" axis across both TensorCores (no-op on v5e/v6e).
    if tb >= B and B >= 16:
        tb = (B + 1) // 2
    if B >= 8:
        tb = max(8, (tb // 8) * 8)  # sublane-dense blocks (multiple of 8)
    # TODO(synk): if even a TB=8 block exceeds the VMEM budget (huge A*S),
    # tile the antenna axis as a second "arbitrary" grid axis with (TB, S)
    # accumulators instead of relying on a single oversized block.
    return max(1, min(tb, B))


def cosine_similarity_loss(w_true, w_pre, reduction="mean"):
    """Pallas TPU implementation of CosineSimilarityLoss.forward.

    Inputs are NCHW-style [B, 2, A, S]: channel 0/1 = real/imag, A antennas,
    S subcarriers (matching the permute(0, 3, 2, 1) in the PyTorch module).
    """
    B, C, A, S = w_true.shape
    assert C == 2, "channel dim must hold (real, imag)"
    assert w_pre.shape == w_true.shape
    if reduction not in ("mean", "sum"):
        raise ValueError(f"unsupported reduction: {reduction}")

    itemsize = jnp.dtype(w_true.dtype).itemsize
    vmem_cap = _vmem_capacity_bytes()
    budget = min(48 << 20, vmem_cap // 2)          # ~48 MiB v5e/v6e, ~32 MiB v7x
    vmem_limit = max(32 << 20, min(vmem_cap - (8 << 20), (vmem_cap * 3) // 4))

    TB = _pick_tb(B, A, S, itemsize, budget)
    num_tiles = pl.cdiv(B, TB)

    # Free, contiguous reshape: each batch item becomes one lane-dense row.
    wt2 = w_true.reshape(B, 2 * A * S)
    wp2 = w_pre.reshape(B, 2 * A * S)

    kernel = functools.partial(_cos2_kernel, A=A, S=S)
    cos2 = pl.pallas_call(
        kernel,
        out_shape=jax.ShapeDtypeStruct((B, S), jnp.float32),
        grid_spec=pltpu.PrefetchScalarGridSpec(
            num_scalar_prefetch=0,
            grid=(num_tiles,),
            in_specs=[
                pl.BlockSpec((TB, 2 * A * S), lambda i: (i, 0)),  # w_true
                pl.BlockSpec((TB, 2 * A * S), lambda i: (i, 0)),  # w_pre
            ],
            out_specs=pl.BlockSpec((TB, S), lambda i: (i, 0)),
        ),
        compiler_params=pltpu.CompilerParams(
            dimension_semantics=("parallel",),
            vmem_limit_bytes=int(vmem_limit),
        ),
    )(wt2, wp2)

    red = jnp.mean(cos2) if reduction == "mean" else jnp.sum(cos2)
    return 1.0 - red


def _reference_loss(w_true, w_pre, reduction="mean"):
    """Pure-JAX port of the PyTorch forward for validation."""
    # permute(0, 3, 2, 1): [B, 2, A, S] -> [B, S, A, 2]
    wt = jnp.transpose(w_true, (0, 3, 2, 1)).astype(jnp.float32)
    wp = jnp.transpose(w_pre, (0, 3, 2, 1)).astype(jnp.float32)
    B, S, A, _ = wt.shape
    wt = wt.reshape(B * S, A, 2)
    wp = wp.reshape(B * S, A, 2)
    tr, ti = wt[..., 0], wt[..., 1]
    pr, pi = wp[..., 0], wp[..., 1]
    num_re = (tr * pr + ti * pi).sum(-1)
    num_im = (ti * pr - tr * pi).sum(-1)
    den0 = (tr ** 2 + ti ** 2).sum(-1)
    den1 = (pr ** 2 + pi ** 2).sum(-1)
    cos = jnp.sqrt(num_re ** 2 + num_im ** 2) / (jnp.sqrt(den0) * jnp.sqrt(den1))
    cos = cos ** 2
    red = cos.mean() if reduction == "mean" else cos.sum()
    return 1.0 - red


if __name__ == "__main__":
    key = jax.random.PRNGKey(0)
    k1, k2 = jax.random.split(key)

    B, C, A, S = 2, 2, 16, 32  # batch, (re/im), antennas, subcarriers
    w_true = jax.random.normal(k1, (B, C, A, S), dtype=jnp.float32)
    w_pre = jax.random.normal(k2, (B, C, A, S), dtype=jnp.float32)

    loss = jax.block_until_ready(cosine_similarity_loss(w_true, w_pre, reduction="mean"))
    ref = jax.block_until_ready(_reference_loss(w_true, w_pre, reduction="mean"))
    assert jnp.allclose(loss, ref, rtol=1e-5, atol=1e-5), (loss, ref)

    # also check the 'sum' reduction path
    loss_s = jax.block_until_ready(cosine_similarity_loss(w_true, w_pre, reduction="sum"))
    ref_s = jax.block_until_ready(_reference_loss(w_true, w_pre, reduction="sum"))
    assert jnp.allclose(loss_s, ref_s, rtol=1e-5, atol=1e-5), (loss_s, ref_s)

    print("KERNEL_OK")
</pallas_src>

<mosaic_0001>
module attributes {stable_mosaic.version = 11 : i64} {
  func.func @_cos2_kernel(%arg0: i32, %arg1: memref<2x1024xf32, #tpu.memory_space<vmem>>, %arg2: memref<2x1024xf32, #tpu.memory_space<vmem>>, %arg3: memref<2x32xf32, #tpu.memory_space<vmem>>) attributes {dimension_semantics = [#tpu.dimension_semantics<parallel>], iteration_bounds = array<i64: 1>, scalar_prefetch = 0 : i64, scratch_operands = 0 : i64, tpu.core_type = #tpu.core_type<tc>, window_params = [{transform_indices = @transform_0, window_bounds = array<i64: 2, 1024>}, {transform_indices = @transform_1, window_bounds = array<i64: 2, 1024>}, {transform_indices = @transform_2, window_bounds = array<i64: 2, 32>}]} {
    %c0 = arith.constant 0 : index
    %c0_0 = arith.constant 0 : index
    %0 = vector.load %arg1[%c0, %c0_0] : memref<2x1024xf32, #tpu.memory_space<vmem>>, vector<2x512xf32>
    %c0_1 = arith.constant 0 : index
    %c512 = arith.constant 512 : index
    %1 = vector.load %arg1[%c0_1, %c512] : memref<2x1024xf32, #tpu.memory_space<vmem>>, vector<2x512xf32>
    %c0_2 = arith.constant 0 : index
    %c0_3 = arith.constant 0 : index
    %2 = vector.load %arg2[%c0_2, %c0_3] : memref<2x1024xf32, #tpu.memory_space<vmem>>, vector<2x512xf32>
    %c0_4 = arith.constant 0 : index
    %c512_5 = arith.constant 512 : index
    %3 = vector.load %arg2[%c0_4, %c512_5] : memref<2x1024xf32, #tpu.memory_space<vmem>>, vector<2x512xf32>
    %4 = arith.mulf %0, %2 : vector<2x512xf32>
    %5 = arith.mulf %1, %3 : vector<2x512xf32>
    %6 = arith.addf %4, %5 : vector<2x512xf32>
    %c256_i32 = arith.constant 256 : i32
    %7 = tpu.dynamic_rotate %6 by %c256_i32 dim 1 : vector<2x512xf32>, i32 -> vector<2x512xf32>
    %8 = arith.addf %6, %7 : vector<2x512xf32>
    %c128_i32 = arith.constant 128 : i32
    %9 = tpu.dynamic_rotate %8 by %c128_i32 dim 1 : vector<2x512xf32>, i32 -> vector<2x512xf32>
    %10 = arith.addf %8, %9 : vector<2x512xf32>
    %c64_i32 = arith.constant 64 : i32
    %11 = tpu.dynamic_rotate %10 by %c64_i32 dim 1 : vector<2x512xf32>, i32 -> vector<2x512xf32>
    %12 = arith.addf %10, %11 : vector<2x512xf32>
    %c32_i32 = arith.constant 32 : i32
    %13 = tpu.dynamic_rotate %12 by %c32_i32 dim 1 : vector<2x512xf32>, i32 -> vector<2x512xf32>
    %14 = arith.addf %12, %13 : vector<2x512xf32>
    %15 = vector.extract_strided_slice %14 {offsets = [0, 0], sizes = [2, 32], strides = [1, 1]} : vector<2x512xf32> to vector<2x32xf32>
    %16 = arith.mulf %1, %2 : vector<2x512xf32>
    %17 = arith.mulf %0, %3 : vector<2x512xf32>
    %18 = arith.subf %16, %17 : vector<2x512xf32>
    %c256_i32_6 = arith.constant 256 : i32
    %19 = tpu.dynamic_rotate %18 by %c256_i32_6 dim 1 : vector<2x512xf32>, i32 -> vector<2x512xf32>
    %20 = arith.addf %18, %19 : vector<2x512xf32>
    %c128_i32_7 = arith.constant 128 : i32
    %21 = tpu.dynamic_rotate %20 by %c128_i32_7 dim 1 : vector<2x512xf32>, i32 -> vector<2x512xf32>
    %22 = arith.addf %20, %21 : vector<2x512xf32>
    %c64_i32_8 = arith.constant 64 : i32
    %23 = tpu.dynamic_rotate %22 by %c64_i32_8 dim 1 : vector<2x512xf32>, i32 -> vector<2x512xf32>
    %24 = arith.addf %22, %23 : vector<2x512xf32>
    %c32_i32_9 = arith.constant 32 : i32
    %25 = tpu.dynamic_rotate %24 by %c32_i32_9 dim 1 : vector<2x512xf32>, i32 -> vector<2x512xf32>
    %26 = arith.addf %24, %25 : vector<2x512xf32>
    %27 = vector.extract_strided_slice %26 {offsets = [0, 0], sizes = [2, 32], strides = [1, 1]} : vector<2x512xf32> to vector<2x32xf32>
    %28 = arith.mulf %0, %0 : vector<2x512xf32>
    %29 = arith.mulf %1, %1 : vector<2x512xf32>
    %30 = arith.addf %28, %29 : vector<2x512xf32>
    %c256_i32_10 = arith.constant 256 : i32
    %31 = tpu.dynamic_rotate %30 by %c256_i32_10 dim 1 : vector<2x512xf32>, i32 -> vector<2x512xf32>
    %32 = arith.addf %30, %31 : vector<2x512xf32>
    %c128_i32_11 = arith.constant 128 : i32
    %33 = tpu.dynamic_rotate %32 by %c128_i32_11 dim 1 : vector<2x512xf32>, i32 -> vector<2x512xf32>
    %34 = arith.addf %32, %33 : vector<2x512xf32>
    %c64_i32_12 = arith.constant 64 : i32
    %35 = tpu.dynamic_rotate %34 by %c64_i32_12 dim 1 : vector<2x512xf32>, i32 -> vector<2x512xf32>
    %36 = arith.addf %34, %35 : vector<2x512xf32>
    %c32_i32_13 = arith.constant 32 : i32
    %37 = tpu.dynamic_rotate %36 by %c32_i32_13 dim 1 : vector<2x512xf32>, i32 -> vector<2x512xf32>
    %38 = arith.addf %36, %37 : vector<2x512xf32>
    %39 = vector.extract_strided_slice %38 {offsets = [0, 0], sizes = [2, 32], strides = [1, 1]} : vector<2x512xf32> to vector<2x32xf32>
    %40 = arith.mulf %2, %2 : vector<2x512xf32>
    %41 = arith.mulf %3, %3 : vector<2x512xf32>
    %42 = arith.addf %40, %41 : vector<2x512xf32>
    %c256_i32_14 = arith.constant 256 : i32
    %43 = tpu.dynamic_rotate %42 by %c256_i32_14 dim 1 : vector<2x512xf32>, i32 -> vector<2x512xf32>
    %44 = arith.addf %42, %43 : vector<2x512xf32>
    %c128_i32_15 = arith.constant 128 : i32
    %45 = tpu.dynamic_rotate %44 by %c128_i32_15 dim 1 : vector<2x512xf32>, i32 -> vector<2x512xf32>
    %46 = arith.addf %44, %45 : vector<2x512xf32>
    %c64_i32_16 = arith.constant 64 : i32
    %47 = tpu.dynamic_rotate %46 by %c64_i32_16 dim 1 : vector<2x512xf32>, i32 -> vector<2x512xf32>
    %48 = arith.addf %46, %47 : vector<2x512xf32>
    %c32_i32_17 = arith.constant 32 : i32
    %49 = tpu.dynamic_rotate %48 by %c32_i32_17 dim 1 : vector<2x512xf32>, i32 -> vector<2x512xf32>
    %50 = arith.addf %48, %49 : vector<2x512xf32>
    %51 = vector.extract_strided_slice %50 {offsets = [0, 0], sizes = [2, 32], strides = [1, 1]} : vector<2x512xf32> to vector<2x32xf32>
    %52 = arith.mulf %15, %15 : vector<2x32xf32>
    %53 = arith.mulf %27, %27 : vector<2x32xf32>
    %54 = arith.addf %52, %53 : vector<2x32xf32>
    %55 = arith.mulf %39, %51 : vector<2x32xf32>
    %56 = arith.divf %54, %55 : vector<2x32xf32>
    %c0_18 = arith.constant 0 : index
    %c0_19 = arith.constant 0 : index
    %57 = vector.load %arg3[%c0_18, %c0_19] : memref<2x32xf32, #tpu.memory_space<vmem>>, vector<2x32xf32>
    tpu.vector_store %arg3[%c0_18, %c0_19], %56 {strides = array<i32>} : memref<2x32xf32, #tpu.memory_space<vmem>>, vector<2x32xf32>,
    return
  }
  func.func @transform_0(%arg0: i32) -> (i32, i32) {
    %c0_i32 = arith.constant 0 : i32
    %c0_i32_0 = arith.constant 0 : i32
    return %arg0, %c0_i32 : i32, i32
  }
  func.func @transform_1(%arg0: i32) -> (i32, i32) {
    %c0_i32 = arith.constant 0 : i32
    %c0_i32_0 = arith.constant 0 : i32
    return %arg0, %c0_i32 : i32, i32
  }
  func.func @transform_2(%arg0: i32) -> (i32, i32) {
    %c0_i32 = arith.constant 0 : i32
    %c0_i32_0 = arith.constant 0 : i32
    return %arg0, %c0_i32 : i32, i32
  }
}

</mosaic_0001>

<bundles_post_ra>
// kernel: tpu_custom_call.1
= control target key start
LH: loop header
LB: loop body
LE: loop exit
PB: predicated region body
PF: predicated region fallthrough
CT: control target
= control target key end

     0   :  { %7 = vsyncpa [#allocation3], 0  ;;  %s796_s0 = inlined_call_operand.hbm [shape: f32[2,1024], index: 0, kind: input, shape index: {}]   ;;  %s797_s1 = inlined_call_operand.hbm [shape: f32[2,1024], index: 1, kind: input, shape index: {}]   ;;  %s798_s2 = inlined_call_operand.hbm [shape: f32[2,32], index: 2, kind: output, shape index: {}]  }
   0x1   :  { %8 = vsyncpa [#allocation6], 0 }
   0x2   :  { %9 = vsyncpa [#allocation4], 0  ;;  %s15_s11 = sshll.u32 %s796_s0, 4  ;;  %s571_s12 = smov [#allocation2]   ;;  %s16_s11 = int_to_ptr.hbm [resolvable:$true] %s15_s11 }
   0x3   :  { %s17_s13 = sshll.u32 %s571_s12, 4  ;;  %s26_s16 = sshll.u32 %s797_s1, 4  ;;  %s18_s13 = int_to_ptr.vmem [resolvable:$true] %s17_s13  ;;  %s27_s16 = int_to_ptr.hbm [resolvable:$true] %s26_s16 }
   0x4   :  { %20 = dma.hbm_to_vmem [thread:$0]  %s16_s11, 256, %s18_s13, [#allocation3]  }
   0x5   :  { %s572_s17 = smov [#allocation5]  }
   0x6   :  { %s28_s18 = sshll.u32 %s572_s17, 4  ;;  %s29_s18 = int_to_ptr.vmem [resolvable:$true] %s28_s18 }
   0x7   :  { %31 = dma.hbm_to_vmem [thread:$0]  %s27_s16, 256, %s29_s18, [#allocation6]  }
   0x8   :  { %565 = dma.done.wait [#allocation3], 256  }
   0x9   :  { %566 = vsyncadd [#allocation3], 4294967040 }
   0xa   :  { %567 = dma.done.wait [#allocation6], 256  }
   0xb   :  { %568 = vsyncadd [#allocation6], 4294967040  ;;  %v40_v0 = vld [vmem:[#allocation2] sm:$0xff]  ;;  %v41_v1 = vld [vmem:[#allocation2 + $0x8] sm:$0xff]  ;;  %vm56_vm0 = vcmask 1041408   ;;  %vm58_vm1 = vcmask 1045508   ;;  %v96_v42 = vlaneseq }
   0xc   :  { %v42_v2 = vld [vmem:[#allocation5] sm:$0xff]  ;;  %v43_v3 = vld [vmem:[#allocation5 + $0x8] sm:$0xff]  ;;  %v249_v9 = vmul.f32 %v40_v0, %v40_v0  ;;  %v250_v10 = vmul.f32 %v41_v1, %v41_v1  ;;  %vm60_vm2 = vcmask 1043456   ;;  %s573_s0 = smov 64   ;;  %s574_s1 = smov 32   ;;  %vm466_vm9 = vcmask 254976  }
   0xd   :  { %v44_v4 = vmul.f32 %v42_v2, %v40_v0  ;;  %v45_v5 = vmul.f32 %v43_v3, %v41_v1  ;;  %v150_v7 = vmul.f32 %v42_v2, %v41_v1  ;;  %v151_v8 = vmul.f32 %v43_v3, %v40_v0  ;;  %s575_s19 = smov [#allocation7]   ;;  %s475_s23 = sshll.u32 %s798_s2, 4  ;;  %s476_s23 = int_to_ptr.hbm [resolvable:$true] %s475_s23 }
   0xe   :  { %v348_v11 = vmul.f32 %v42_v2, %v42_v2  ;;  %v349_v12 = vmul.f32 %v43_v3, %v43_v3  ;;  %v599_v16 = vadd.f32 %v250_v10, %v249_v9  ;;  %v613_v45 = vand.u32 127, %v96_v42  ;;  %s473_s20 = sshll.u32 %s575_s19, 4  ;;  %s474_s20 = int_to_ptr.vmem [resolvable:$true] %s473_s20 }
   0xf   :  { %v46_v6 = vadd.f32 %v45_v5, %v44_v4  ;;  %v597_v15 = vsub.f32 %v150_v7, %v151_v8 }
  0x10   :  { %v601_v19 = vadd.f32 %v349_v12, %v348_v11  ;;  %vm98_vm3 = vcmp.lt.s32.totalorder %v613_v45, 64  ;;  %vm133_vm4 = vcmp.lt.s32.totalorder %v613_v45, 32 }
  0x11   :  { %48 = vst [vmem:[#allocation1] ss:$4 sm:$0xff] %v46_v6 }
  0x18   :  { %v49_v13 = vld.sshfl [vmem:[#allocation1] sm:$0xff pattern:$0x73625140]  ;;  %v50_v14 = vld.sshfl [vmem:[#allocation1 + $0x8] sm:$0xff pattern:$0x73625140] }
  0x19   :  { %v51_v17 = vld.sshfl [vmem:[#allocation1 + $0x10] sm:$0xff pattern:$0x73625140]  ;;  %v52_v18 = vld.sshfl [vmem:[#allocation1 + $0x18] sm:$0xff pattern:$0x73625140] }
  0x1a   :  { %v53_v20 = vrot.slane %v52_v18, 6  ;;  %v54_v21 = vrot.slane %v49_v13, 4  ;;  %v55_v22 = vrot.slane %v50_v14, 2 }
  0x1c   :  { %v57_v23 = vsel %vm56_vm0, %v51_v17, %v53_v20  ;;  %v59_v24 = vsel %vm58_vm1, %v54_v21, %v55_v22 }
  0x1d   :  { %v61_v25 = vsel %vm60_vm2, %v57_v23, %v59_v24 }
  0x1e   :  { %v63_v26 = vadd.f32 %v61_v25, %v46_v6 }
  0x20   :  { %65 = vst [vmem:[#allocation1] ss:$4 sm:$0xff] %v63_v26 }
  0x27   :  { %v66_v27 = vld.sshfl [vmem:[#allocation1] sm:$0xff pattern:$0x73625140]  ;;  %v67_v28 = vld.sshfl [vmem:[#allocation1 + $0x8] sm:$0xff pattern:$0x73625140] }
  0x28   :  { %v68_v29 = vld.sshfl [vmem:[#allocation1 + $0x10] sm:$0xff pattern:$0x73625140]  ;;  %v69_v30 = vld.sshfl [vmem:[#allocation1 + $0x18] sm:$0xff pattern:$0x73625140] }
  0x29   :  { %v70_v31 = vrot.slane %v66_v27, 6  ;;  %v71_v32 = vrot.slane %v67_v28, 4  ;;  %v72_v33 = vrot.slane %v68_v29, 2 }
  0x2b   :  { %v73_v34 = vsel %vm56_vm0, %v69_v30, %v70_v31  ;;  %v74_v35 = vsel %vm58_vm1, %v71_v32, %v72_v33 }
  0x2c   :  { %v75_v36 = vsel %vm60_vm2, %v73_v34, %v74_v35 }
  0x2d   :  { %v77_v37 = vadd.f32 %v75_v36, %v63_v26 }
  0x2f   :  { %79 = vst [vmem:[#allocation1] ss:$4 sm:$0xff] %v77_v37 }
  0x36   :  { %v82_v38 = vld.sshfl [vmem:[#allocation1 + $0x10] sm:$0xff pattern:$0x73625140]  ;;  %v80_v39 = vld.sshfl [vmem:[#allocation1] sm:$0xff pattern:$0x73625140] }
  0x37   :  { %92 = vrot.lane.b32.xlu1 %v82_v38, %s573_s0  ;;  %88 = vrot.lane.b32.xlu0 %v80_v39, %s573_s0  ;;  %v83_v40 = vld.sshfl [vmem:[#allocation1 + $0x18] sm:$0xff pattern:$0x73625140]  ;;  %v81_v41 = vld.sshfl [vmem:[#allocation1 + $0x8] sm:$0xff pattern:$0x73625140] }
  0x3f   :  { %94 = vrot.lane.b32.xlu1 %v83_v40, %s573_s0  ;;  %90 = vrot.lane.b32.xlu0 %v81_v41, %s573_s0 }
  0xa9   :  { %v93_v43 = vpop.permute.xlu1 %92  ;;  %v89_v44 = vpop.permute.xlu0 %88 }
  0xb1   :  { %v95_v46 = vpop.permute.xlu1 %94  ;;  %v91_v47 = vpop.permute.xlu0 %90 }
  0xb2   :  { %v99_v48 = vsel %vm98_vm3, %v93_v43, %v95_v46  ;;  %v100_v49 = vsel %vm98_vm3, %v91_v47, %v93_v43  ;;  %v101_v50 = vsel %vm98_vm3, %v89_v44, %v91_v47  ;;  %v102_v54 = vsel %vm98_vm3, %v95_v46, %v89_v44 }
  0xb3   :  { %v109_v51 = vrot.slane %v99_v48, 2  ;;  %v107_v52 = vrot.slane %v101_v50, 6  ;;  %v108_v53 = vrot.slane %v100_v49, 4 }
  0xb5   :  { %v110_v55 = vsel %vm56_vm0, %v102_v54, %v107_v52  ;;  %v111_v56 = vsel %vm58_vm1, %v108_v53, %v109_v51 }
  0xb6   :  { %v112_v57 = vsel %vm60_vm2, %v110_v55, %v111_v56 }
  0xb7   :  { %v627_v58 = vadd.f32 %v112_v57, %v77_v37 }
  0xb9   :  { %116 = vst [vmem:[#allocation1] ss:$4 sm:$0xff] %v627_v58 }
  0xc0   :  { %v630_v59 = vld.sshfl [vmem:[#allocation1] sm:$0xff pattern:$0x73625140]  ;;  %v632_v60 = vld.sshfl [vmem:[#allocation1 + $0x8] sm:$0xff pattern:$0x73625140] }
  0xc1   :  { %v634_v61 = vld.sshfl [vmem:[#allocation1 + $0x10] sm:$0xff pattern:$0x73625140]  ;;  %v636_v62 = vld.sshfl [vmem:[#allocation1 + $0x18] sm:$0xff pattern:$0x73625140] }
  0xc2   :  { %154 = vst [vmem:[#allocation1] ss:$4 sm:$0xff] %v597_v15 }
  0xc9   :  { %v155_v63 = vld.sshfl [vmem:[#allocation1] sm:$0xff pattern:$0x73625140]  ;;  %v156_v0 = vld.sshfl [vmem:[#allocation1 + $0x8] sm:$0xff pattern:$0x73625140] }
  0xca   :  { %v157_v1 = vld.sshfl [vmem:[#allocation1 + $0x10] sm:$0xff pattern:$0x73625140]  ;;  %v158_v2 = vld.sshfl [vmem:[#allocation1 + $0x18] sm:$0xff pattern:$0x73625140] }
  0xcb   :  { %v159_v3 = vrot.slane %v158_v2, 6  ;;  %v160_v4 = vrot.slane %v155_v63, 4  ;;  %v161_v5 = vrot.slane %v156_v0, 2 }
  0xcd   :  { %v162_v6 = vsel %vm56_vm0, %v157_v1, %v159_v3  ;;  %v163_v7 = vsel %vm58_vm1, %v160_v4, %v161_v5 }
  0xce   :  { %v164_v8 = vsel %vm60_vm2, %v162_v6, %v163_v7 }
  0xcf   :  { %v166_v9 = vadd.f32 %v164_v8, %v597_v15 }
  0xd1   :  { %168 = vst [vmem:[#allocation1] ss:$4 sm:$0xff] %v166_v9 }
  0xd8   :  { %v169_v10 = vld.sshfl [vmem:[#allocation1] sm:$0xff pattern:$0x73625140]  ;;  %v170_v11 = vld.sshfl [vmem:[#allocation1 + $0x8] sm:$0xff pattern:$0x73625140] }
  0xd9   :  { %v171_v12 = vld.sshfl [vmem:[#allocation1 + $0x10] sm:$0xff pattern:$0x73625140]  ;;  %v172_v13 = vld.sshfl [vmem:[#allocation1 + $0x18] sm:$0xff pattern:$0x73625140] }
  0xda   :  { %v173_v14 = vrot.slane %v169_v10, 6  ;;  %v174_v17 = vrot.slane %v170_v11, 4  ;;  %v175_v18 = vrot.slane %v171_v12, 2 }
  0xdc   :  { %v176_v20 = vsel %vm56_vm0, %v172_v13, %v173_v14  ;;  %v177_v21 = vsel %vm58_vm1, %v174_v17, %v175_v18 }
  0xdd   :  { %v178_v22 = vsel %vm60_vm2, %v176_v20, %v177_v21 }
  0xde   :  { %v180_v23 = vadd.f32 %v178_v22, %v166_v9 }
  0xe0   :  { %182 = vst [vmem:[#allocation1] ss:$4 sm:$0xff] %v180_v23 }
  0xe7   :  { %v186_v24 = vld.sshfl [vmem:[#allocation1 + $0x18] sm:$0xff pattern:$0x73625140]  ;;  %v185_v25 = vld.sshfl [vmem:[#allocation1 + $0x10] sm:$0xff pattern:$0x73625140] }
  0xe8   :  { %197 = vrot.lane.b32.xlu1 %v186_v24, %s573_s0  ;;  %195 = vrot.lane.b32.xlu0 %v185_v25, %s573_s0  ;;  %v183_v15 = vld.sshfl [vmem:[#allocation1] sm:$0xff pattern:$0x73625140]  ;;  %v184_v26 = vld.sshfl [vmem:[#allocation1 + $0x8] sm:$0xff pattern:$0x73625140] }
  0xe9   :  { %191 = vrot.lane.b32.xlu2 %v183_v15, %s573_s0 }
  0xf1   :  { %193 = vrot.lane.b32.xlu2 %v184_v26, %s573_s0 }
 0x143   :  { %v192_v27 = vpop.permute.xlu2 %191 }
 0x14b   :  { %v194_v28 = vpop.permute.xlu2 %193 }
 0x14c   :  { %v201_v29 = vsel %vm98_vm3, %v192_v27, %v194_v28 }
 0x14d   :  { %v207_v35 = vrot.slane %v201_v29, 6 }
 0x15a   :  { %v198_v30 = vpop.permute.xlu1 %197  ;;  %v196_v31 = vpop.permute.xlu0 %195 }
 0x15b   :  { %v202_v32 = vsel %vm98_vm3, %v198_v30, %v192_v27  ;;  %v199_v33 = vsel %vm98_vm3, %v196_v31, %v198_v30  ;;  %v200_v34 = vsel %vm98_vm3, %v194_v28, %v196_v31 }
 0x15c   :  { %v208_v36 = vrot.slane %v200_v34, 4  ;;  %v209_v37 = vrot.slane %v199_v33, 2  ;;  %v210_v38 = vsel %vm56_vm0, %v202_v32, %v207_v35 }
 0x15e   :  { %v211_v39 = vsel %vm58_vm1, %v208_v36, %v209_v37 }
 0x15f   :  { %v212_v40 = vsel %vm60_vm2, %v210_v38, %v211_v39 }
 0x160   :  { %v661_v41 = vadd.f32 %v212_v40, %v180_v23 }
 0x162   :  { %216 = vst [vmem:[#allocation1] ss:$4 sm:$0xff] %v661_v41 }
 0x169   :  { %v664_v42 = vld.sshfl [vmem:[#allocation1] sm:$0xff pattern:$0x73625140]  ;;  %v666_v43 = vld.sshfl [vmem:[#allocation1 + $0x8] sm:$0xff pattern:$0x73625140] }
 0x16a   :  { %v668_v44 = vld.sshfl [vmem:[#allocation1 + $0x10] sm:$0xff pattern:$0x73625140]  ;;  %v670_v46 = vld.sshfl [vmem:[#allocation1 + $0x18] sm:$0xff pattern:$0x73625140] }
 0x16b   :  { %253 = vst [vmem:[#allocation1] ss:$4 sm:$0xff] %v599_v16 }
 0x172   :  { %v254_v47 = vld.sshfl [vmem:[#allocation1] sm:$0xff pattern:$0x73625140]  ;;  %v255_v48 = vld.sshfl [vmem:[#allocation1 + $0x8] sm:$0xff pattern:$0x73625140] }
 0x173   :  { %v256_v49 = vld.sshfl [vmem:[#allocation1 + $0x10] sm:$0xff pattern:$0x73625140]  ;;  %v257_v50 = vld.sshfl [vmem:[#allocation1 + $0x18] sm:$0xff pattern:$0x73625140] }
 0x174   :  { %v258_v51 = vrot.slane %v257_v50, 6  ;;  %v259_v52 = vrot.slane %v254_v47, 4  ;;  %v260_v53 = vrot.slane %v255_v48, 2 }
 0x176   :  { %v261_v54 = vsel %vm56_vm0, %v256_v49, %v258_v51  ;;  %v262_v55 = vsel %vm58_vm1, %v259_v52, %v260_v53 }
 0x177   :  { %v263_v56 = vsel %vm60_vm2, %v261_v54, %v262_v55 }
 0x178   :  { %v265_v57 = vadd.f32 %v263_v56, %v599_v16 }
 0x17a   :  { %267 = vst [vmem:[#allocation1] ss:$4 sm:$0xff] %v265_v57 }
 0x181   :  { %v268_v63 = vld.sshfl [vmem:[#allocation1] sm:$0xff pattern:$0x73625140]  ;;  %v269_v0 = vld.sshfl [vmem:[#allocation1 + $0x8] sm:$0xff pattern:$0x73625140] }
 0x182   :  { %v270_v1 = vld.sshfl [vmem:[#allocation1 + $0x10] sm:$0xff pattern:$0x73625140]  ;;  %v271_v2 = vld.sshfl [vmem:[#allocation1 + $0x18] sm:$0xff pattern:$0x73625140] }
 0x183   :  { %v272_v3 = vrot.slane %v268_v63, 6  ;;  %v273_v4 = vrot.slane %v269_v0, 4  ;;  %v274_v5 = vrot.slane %v270_v1, 2 }
 0x185   :  { %v275_v6 = vsel %vm56_vm0, %v271_v2, %v272_v3  ;;  %v276_v7 = vsel %vm58_vm1, %v273_v4, %v274_v5 }
 0x186   :  { %v277_v8 = vsel %vm60_vm2, %v275_v6, %v276_v7 }
 0x187   :  { %v279_v9 = vadd.f32 %v277_v8, %v265_v57 }
 0x189   :  { %281 = vst [vmem:[#allocation1] ss:$4 sm:$0xff] %v279_v9 }
 0x190   :  { %v284_v10 = vld.sshfl [vmem:[#allocation1 + $0x10] sm:$0xff pattern:$0x73625140]  ;;  %v283_v11 = vld.sshfl [vmem:[#allocation1 + $0x8] sm:$0xff pattern:$0x73625140] }
 0x191   :  { %294 = vrot.lane.b32.xlu1 %v284_v10, %s573_s0  ;;  %292 = vrot.lane.b32.xlu0 %v283_v11, %s573_s0  ;;  %v282_v16 = vld.sshfl [vmem:[#allocation1] sm:$0xff pattern:$0x73625140]  ;;  %v285_v12 = vld.sshfl [vmem:[#allocation1 + $0x18] sm:$0xff pattern:$0x73625140] }
 0x192   :  { %290 = vrot.lane.b32.xlu2 %v282_v16, %s573_s0 }
 0x19a   :  { %296 = vrot.lane.b32.xlu2 %v285_v12, %s573_s0 }
 0x1ec   :  { %v291_v13 = vpop.permute.xlu2 %290 }
 0x1f4   :  { %v297_v14 = vpop.permute.xlu2 %296 }
 0x1f5   :  { %v301_v15 = vsel %vm98_vm3, %v297_v14, %v291_v13 }
 0x203   :  { %v295_v17 = vpop.permute.xlu1 %294  ;;  %v293_v18 = vpop.permute.xlu0 %292 }
 0x204   :  { %v298_v20 = vsel %vm98_vm3, %v295_v17, %v297_v14  ;;  %v299_v21 = vsel %vm98_vm3, %v293_v18, %v295_v17  ;;  %v300_v22 = vsel %vm98_vm3, %v291_v13, %v293_v18 }
 0x205   :  { %v308_v23 = vrot.slane %v298_v20, 2  ;;  %v306_v24 = vrot.slane %v300_v22, 6  ;;  %v307_v25 = vrot.slane %v299_v21, 4 }
 0x207   :  { %v309_v26 = vsel %vm56_vm0, %v301_v15, %v306_v24  ;;  %v310_v27 = vsel %vm58_vm1, %v307_v25, %v308_v23 }
 0x208   :  { %v311_v28 = vsel %vm60_vm2, %v309_v26, %v310_v27 }
 0x209   :  { %v695_v29 = vadd.f32 %v311_v28, %v279_v9 }
 0x20b   :  { %315 = vst [vmem:[#allocation1] ss:$4 sm:$0xff] %v695_v29 }
 0x212   :  { %v316_v30 = vld.sshfl [vmem:[#allocation1] sm:$0xff pattern:$0x73625140]  ;;  %v317_v31 = vld.sshfl [vmem:[#allocation1 + $0x8] sm:$0xff pattern:$0x73625140] }
 0x213   :  { %v318_v32 = vld.sshfl [vmem:[#allocation1 + $0x10] sm:$0xff pattern:$0x73625140]  ;;  %v319_v33 = vld.sshfl [vmem:[#allocation1 + $0x18] sm:$0xff pattern:$0x73625140] }
 0x214   :  { %352 = vst [vmem:[#allocation1] ss:$4 sm:$0xff] %v601_v19 }
 0x21b   :  { %v353_v34 = vld.sshfl [vmem:[#allocation1] sm:$0xff pattern:$0x73625140]  ;;  %v354_v35 = vld.sshfl [vmem:[#allocation1 + $0x8] sm:$0xff pattern:$0x73625140] }
 0x21c   :  { %v355_v36 = vld.sshfl [vmem:[#allocation1 + $0x10] sm:$0xff pattern:$0x73625140]  ;;  %v356_v37 = vld.sshfl [vmem:[#allocation1 + $0x18] sm:$0xff pattern:$0x73625140] }
 0x21d   :  { %v357_v38 = vrot.slane %v356_v37, 6  ;;  %v358_v39 = vrot.slane %v353_v34, 4  ;;  %v359_v40 = vrot.slane %v354_v35, 2 }
 0x21f   :  { %v360_v47 = vsel %vm56_vm0, %v355_v36, %v357_v38  ;;  %v361_v48 = vsel %vm58_vm1, %v358_v39, %v359_v40 }
 0x220   :  { %v362_v49 = vsel %vm60_vm2, %v360_v47, %v361_v48 }
 0x221   :  { %v364_v50 = vadd.f32 %v362_v49, %v601_v19 }
 0x223   :  { %366 = vst [vmem:[#allocation1] ss:$4 sm:$0xff] %v364_v50 }
 0x22a   :  { %v367_v51 = vld.sshfl [vmem:[#allocation1] sm:$0xff pattern:$0x73625140]  ;;  %v368_v52 = vld.sshfl [vmem:[#allocation1 + $0x8] sm:$0xff pattern:$0x73625140] }
 0x22b   :  { %v369_v53 = vld.sshfl [vmem:[#allocation1 + $0x10] sm:$0xff pattern:$0x73625140]  ;;  %v370_v54 = vld.sshfl [vmem:[#allocation1 + $0x18] sm:$0xff pattern:$0x73625140] }
 0x22c   :  { %v371_v55 = vrot.slane %v367_v51, 6  ;;  %v372_v56 = vrot.slane %v368_v52, 4  ;;  %v373_v57 = vrot.slane %v369_v53, 2 }
 0x22e   :  { %v374_v63 = vsel %vm56_vm0, %v370_v54, %v371_v55  ;;  %v375_v0 = vsel %vm58_vm1, %v372_v56, %v373_v57 }
 0x22f   :  { %v376_v1 = vsel %vm60_vm2, %v374_v63, %v375_v0 }
 0x230   :  { %v378_v2 = vadd.f32 %v376_v1, %v364_v50 }
 0x232   :  { %380 = vst [vmem:[#allocation1] ss:$4 sm:$0xff] %v378_v2 }
 0x239   :  { %v383_v3 = vld.sshfl [vmem:[#allocation1 + $0x10] sm:$0xff pattern:$0x73625140]  ;;  %v382_v4 = vld.sshfl [vmem:[#allocation1 + $0x8] sm:$0xff pattern:$0x73625140] }
 0x23a   :  { %393 = vrot.lane.b32.xlu2 %v383_v3, %s573_s0  ;;  %391 = vrot.lane.b32.xlu1 %v382_v4, %s573_s0  ;;  %v381_v19 = vld.sshfl [vmem:[#allocation1] sm:$0xff pattern:$0x73625140]  ;;  %v384_v5 = vld.sshfl [vmem:[#allocation1 + $0x18] sm:$0xff pattern:$0x73625140] }
 0x23b   :  { %389 = vrot.lane.b32.xlu0 %v381_v19, %s573_s0 }
 0x242   :  { %326 = vrot.lane.b32.xlu2 %v317_v31, %s574_s1  ;;  %324 = vrot.lane.b32.xlu1 %v316_v30, %s574_s1 }
 0x243   :  { %395 = vrot.lane.b32.xlu0 %v384_v5, %s573_s0 }
 0x24a   :  { %330 = vrot.lane.b32.xlu1 %v319_v33, %s574_s1 }
 0x24b   :  { %328 = vrot.lane.b32.xlu0 %v318_v32, %s574_s1 }
 0x252   :  { %127 = vrot.lane.b32.xlu1 %v632_v60, %s574_s1 }
 0x253   :  { %125 = vrot.lane.b32.xlu0 %v630_v59, %s574_s1 }
 0x294   :  { %v394_v7 = vpop.permute.xlu2 %393 }
 0x2ac   :  { %v392_v8 = vpop.permute.xlu1 %391 }
 0x2ad   :  { %v390_v6 = vpop.permute.xlu0 %389  ;;  %v398_v9 = vsel %vm98_vm3, %v392_v8, %v394_v7 }
 0x2ae   :  { %v399_v10 = vsel %vm98_vm3, %v390_v6, %v392_v8  ;;  %v406_v11 = vrot.slane %v398_v9, 4 }
 0x2af   :  { %v405_v13 = vrot.slane %v399_v10, 6 }
 0x2b4   :  { %v325_v25 = vpop.permute.xlu1 %324 }
 0x2b5   :  { %v396_v16 = vpop.permute.xlu0 %395 }
 0x2b6   :  { %v397_v12 = vsel %vm98_vm3, %v394_v7, %v396_v16  ;;  %v400_v60 = vsel %vm98_vm3, %v396_v16, %v390_v6 }
 0x2b7   :  { %v407_v14 = vrot.slane %v397_v12, 2  ;;  %v408_v59 = vsel %vm56_vm0, %v400_v60, %v405_v13 }
 0x2b9   :  { %v409_v17 = vsel %vm58_vm1, %v406_v11, %v407_v14 }
 0x2ba   :  { %v410_v18 = vsel %vm60_vm2, %v408_v59, %v409_v17 }
 0x2bb   :  { %v412_v20 = vadd.f32 %v410_v18, %v378_v2 }
 0x2bc   :  { %v331_v15 = vpop.permute.xlu1 %330 }
 0x2bd   :  { %414 = vst [vmem:[#allocation1] ss:$4 sm:$0xff] %v412_v20  ;;  %v329_v26 = vpop.permute.xlu0 %328  ;;  %v335_v32 = vsel %vm133_vm4, %v331_v15, %v325_v25 }
 0x2c4   :  { %v417_v21 = vld.sshfl [vmem:[#allocation1 + $0x10] sm:$0xff pattern:$0x73625140]  ;;  %v416_v22 = vld.sshfl [vmem:[#allocation1 + $0x8] sm:$0xff pattern:$0x73625140]  ;;  %v128_v27 = vpop.permute.xlu1 %127 }
 0x2c5   :  { %427 = vrot.lane.b32.xlu1 %v417_v21, %s574_s1  ;;  %425 = vrot.lane.b32.xlu0 %v416_v22, %s574_s1  ;;  %v415_v23 = vld.sshfl [vmem:[#allocation1] sm:$0xff pattern:$0x73625140]  ;;  %v418_v24 = vld.sshfl [vmem:[#allocation1 + $0x18] sm:$0xff pattern:$0x73625140]  ;;  %v126_v28 = vpop.permute.xlu0 %125 }
 0x2c6   :  { %423 = vrot.lane.b32.xlu2 %v415_v23, %s574_s1  ;;  %v136_v4 = vsel %vm133_vm4, %v126_v28, %v128_v27 }
 0x2cd   :  { %225 = vrot.lane.b32.xlu1 %v664_v42, %s574_s1  ;;  %131 = vrot.lane.b32.xlu0 %v636_v62, %s574_s1  ;;  %v327_v42 = vpop.permute.xlu2 %326 }
 0x2ce   :  { %429 = vrot.lane.b32.xlu2 %v418_v24, %s574_s1 }
 0x2d5   :  { %231 = vrot.lane.b32.xlu1 %v670_v46, %s574_s1  ;;  %229 = vrot.lane.b32.xlu0 %v668_v44, %s574_s1  ;;  %v332_v46 = vsel %vm133_vm4, %v329_v26, %v331_v15  ;;  %v333_v44 = vsel %vm133_vm4, %v327_v42, %v329_v26 }
 0x2d6   :  { %129 = vrot.lane.b32.xlu2 %v634_v61, %s574_s1  ;;  %v341_v61 = vrot.slane %v333_v44, 4  ;;  %v342_v31 = vrot.slane %v332_v46, 2 }
 0x2d8   :  { %v344_v34 = vsel %vm58_vm1, %v341_v61, %v342_v31 }
 0x2de   :  { %227 = vrot.lane.b32.xlu2 %v666_v43, %s574_s1  ;;  %v334_v43 = vsel %vm133_vm4, %v325_v25, %v327_v42 }
 0x2df   :  { %v340_v33 = vrot.slane %v334_v43, 6 }
 0x2e1   :  { %v343_v40 = vsel %vm56_vm0, %v335_v32, %v340_v33 }
 0x2e2   :  { %v345_v50 = vsel %vm60_vm2, %v343_v40, %v344_v34 }
 0x2e3   :  { %v347_v56 = vadd.f32 %v345_v50, %v695_v29  ;;  %v142_v29 = vrot.slane %v136_v4, 6 }
 0x320   :  { %v424_v62 = vpop.permute.xlu2 %423 }
 0x328   :  { %v430_v30 = vpop.permute.xlu2 %429 }
 0x329   :  { %v434_v51 = vsel %vm133_vm4, %v430_v30, %v424_v62 }
 0x330   :  { %v130_v52 = vpop.permute.xlu2 %129 }
 0x331   :  { %v135_v63 = vsel %vm133_vm4, %v128_v27, %v130_v52 }
 0x332   :  { %v143_v5 = vrot.slane %v135_v63, 4 }
 0x337   :  { %v428_v35 = vpop.permute.xlu1 %427  ;;  %v426_v36 = vpop.permute.xlu0 %425 }
 0x338   :  { %v431_v37 = vsel %vm133_vm4, %v428_v35, %v430_v30  ;;  %v432_v38 = vsel %vm133_vm4, %v426_v36, %v428_v35  ;;  %v433_v39 = vsel %vm133_vm4, %v424_v62, %v426_v36  ;;  %v228_v8 = vpop.permute.xlu2 %227 }
 0x339   :  { %v441_v47 = vrot.slane %v431_v37, 2  ;;  %v439_v48 = vrot.slane %v433_v39, 6  ;;  %v440_v49 = vrot.slane %v432_v38, 4 }
 0x33b   :  { %v442_v53 = vsel %vm56_vm0, %v434_v51, %v439_v48  ;;  %v443_v54 = vsel %vm58_vm1, %v440_v49, %v441_v47 }
 0x33c   :  { %v444_v55 = vsel %vm60_vm2, %v442_v53, %v443_v54 }
 0x33d   :  { %v446_v57 = vadd.f32 %v444_v55, %v412_v20 }
 0x33f   :  { %v450_v0 = vmul.f32 %v446_v57, %v347_v56  ;;  %v226_v1 = vpop.permute.xlu1 %225  ;;  %v132_v2 = vpop.permute.xlu0 %131 }
 0x340   :  { %v134_v3 = vsel %vm133_vm4, %v130_v52, %v132_v2  ;;  %v137_v6 = vsel %vm133_vm4, %v132_v2, %v126_v28  ;;  %v235_v9 = vsel %vm133_vm4, %v226_v1, %v228_v8 }
 0x341   :  { %491 = vrcp.f32 %v450_v0  ;;  %v144_v19 = vrot.slane %v134_v3, 2  ;;  %v145_v10 = vsel %vm56_vm0, %v137_v6, %v142_v29  ;;  %v241_v18 = vrot.slane %v235_v9, 6 }
 0x342   :  { %v462_v42 = vand.u32 2147483648, %v450_v0  ;;  %v460_v62 = vand.u32 2147483647, %v450_v0  ;;  %vm456_vm6 = vweird.f32 %v450_v0 }
 0x343   :  { %v146_v7 = vsel %vm58_vm1, %v143_v5, %v144_v19 }
 0x344   :  { %v147_v16 = vsel %vm60_vm2, %v145_v10, %v146_v7  ;;  %v463_v44 = vor.u32 1.1754944e-38, %v462_v42  ;;  %vm461_vm8 = vcmp.eq.f32.partialorder %v460_v62, 8.507059e+37 }
 0x345   :  { %v149_v23 = vadd.f32 %v147_v16, %v627_v58 }
 0x347   :  { %v492_v11 = vpop.eup %491  ;;  %v232_v12 = vpop.permute.xlu1 %231  ;;  %v447_v28 = vmul.f32 %v149_v23, %v149_v23 }
 0x348   :  { %v230_v60 = vpop.permute.xlu0 %229  ;;  %v236_v13 = vsel %vm133_vm4, %v232_v12, %v226_v1  ;;  %v452_v17 = vmul.f32 %v492_v11, %v450_v0  ;;  %vm457_vm5 = vweird.f32 %v492_v11 }
 0x349   :  { %v233_v14 = vsel %vm133_vm4, %v230_v60, %v232_v12  ;;  %v234_v59 = vsel %vm133_vm4, %v228_v8, %v230_v60  ;;  %v244_v24 = vsel %vm56_vm0, %v236_v13, %v241_v18  ;;  %vm458_vm7 = vmor %vm456_vm6, %vm457_vm5 }
 0x34a   :  { %v242_v20 = vrot.slane %v234_v59, 4  ;;  %v243_v21 = vrot.slane %v233_v14, 2  ;;  %v453_v22 = vsub.f32 1.0, %v452_v17 }
 0x34c   :  { %v245_v25 = vsel %vm58_vm1, %v242_v20, %v243_v21  ;;  %v454_v26 = vmul.f32 %v492_v11, %v453_v22 }
 0x34d   :  { %v246_v15 = vsel %vm60_vm2, %v244_v24, %v245_v25 }
 0x34e   :  { %v248_v45 = vadd.f32 %v246_v15, %v661_v41  ;;  %v455_v27 = vadd.f32 %v492_v11, %v454_v26 }
 0x350   :  { %v448_v46 = vmul.f32 %v248_v45, %v248_v45  ;;  %v459_v30 = vsel %vm458_vm7, %v492_v11, %v455_v27 }
 0x351   :  { %v464_v61 = vsel %vm461_vm8, %v463_v44, %v459_v30 }
 0x352   :  { %v449_v58 = vadd.f32 %v448_v46, %v447_v28 }
 0x354   :  { %v465_v31 = vmul.f32 %v464_v61, %v449_v58 }
 0x356   :  { %467 = vst.msk [vmem:[#allocation7] sm:$0x3] %vm466_vm9, %v465_v31 }
 0x357   :  { %478 = dma.vmem_to_hbm [thread:$0]  %s474_s20, 32, %s476_s23, [#allocation4]  }
 0x358   :  { %569 = dma.done.wait [#allocation4], 32  }
 0x359   :  { %570 = vsyncadd [#allocation4], 4294967264 }
 0x35a   :  { %483 = vsyncpa [#allocation3], 1 }
 0x35b   :  { %484 = vsyncpa [#allocation6], 1 }
 0x35c   :  { %485 = vsyncpa [#allocation4], 1 }

</bundles_post_ra>
